<compile_context>
chip_gen: v7x
topology: tpu7x:2x2x1
jax: 0.10.0
libtpu: 0.0.40
codegen_flags: <defaults>
</compile_context>

<pallas_src>
import math
import functools

import jax
import jax.numpy as jnp
from jax import lax
from jax.experimental import pallas as pl
from jax.experimental.pallas import tpu as pltpu


def _round_up(x, m):
    return ((x + m - 1) // m) * m


def gaussianface_kernel(xn_ref, wt_ref, label_ref, phi_ref, scale_ref, o_ref,
                        *, tile_n):
    # (tile_b, K) bf16 @ (K, tile_n) bf16 -> (tile_b, tile_n) f32 on the MXU.
    # 1/||w_j|| is already folded into wt, so this IS the cosine.
    cosine = jnp.dot(xn_ref[...], wt_ref[...],
                     preferred_element_type=jnp.float32)

    # Global column ids as a (1, tile_n) iota, broadcast against (tile_b, 1)
    # labels.  Class tiles are grid axis 0.
    col0 = pl.program_id(0) * tile_n
    col_ids = col0 + lax.broadcasted_iota(jnp.int32, (1, cosine.shape[1]), 1)
    one_hot = col_ids == label_ref[...]                      # (tile_b, tile_n)

    # phi (margin-transformed label-column value) is precomputed in fp32 in
    # the wrapper; here it is only scattered into the label column.
    out = jnp.where(one_hot, phi_ref[...], cosine)
    o_ref[...] = (out * scale_ref[...]).astype(o_ref.dtype)


def prepare_gaussianface_weight(weight):
    """Fold 1/||w_j|| into a bf16 (in_features, out_features) weight copy.

    Cache / reuse the result across forward calls to avoid re-reading the
    fp32 weight from HBM every step (it only changes after an optimizer step).
    Returns (wt_bf (K, N) bf16, w_inv (N,) f32).
    """
    w_inv = lax.rsqrt(
        jnp.maximum(jnp.sum(weight * weight, axis=-1, keepdims=True), 1e-24))
    wt_bf = (weight * w_inv).T.astype(jnp.bfloat16)          # (K, N), norm folded
    return wt_bf, w_inv[:, 0]


def gaussian_face(confidence, x, weight, label, *, s=64.0, m=0.5, gaussian=True,
                  tile_b=256, tile_n=2048, prepared_weight=None):
    B, in_features = x.shape
    out_features = weight.shape[0]

    cos_m = math.cos(m)
    sin_m = math.sin(m)
    th = math.cos(math.pi - m)
    mm = math.sin(math.pi - m) * m

    # --- batch-side prep, O(B*K), hoisted out of the kernel ---
    # F.normalize(x, dim=1, eps=1e-12) == x / max(||x||, eps)
    xn = x * lax.rsqrt(jnp.maximum(jnp.sum(x * x, axis=-1, keepdims=True), 1e-24))

    # --- weight prep (single pass over the fp32 weight; cacheable) ---
    if prepared_weight is None:
        prepared_weight = prepare_gaussianface_weight(weight)
    wt_bf, w_inv = prepared_weight                            # (K, N) bf16, (N,) f32

    # --- fp32 margin transform for the label column only, O(B*K) ---
    label = jnp.reshape(label, (B,)).astype(jnp.int32)
    wn_label = weight[label] * w_inv[label][:, None]          # (B, K) fp32
    cos_l = jnp.sum(xn * wn_label, axis=-1, keepdims=True)    # (B, 1) fp32
    sin_l = jnp.sqrt(jnp.maximum(1.0 - cos_l * cos_l, 0.0))   # clamp: no NaN
    phi = cos_l * cos_m - sin_l * sin_m
    phi = phi.astype(jnp.float16).astype(jnp.float32)         # torch .half() round-trip
    phi = jnp.where(cos_l > th, phi, cos_l - mm)

    if gaussian:
        conf = jnp.clip(jnp.reshape(confidence, (B, 1)).astype(jnp.float32) - 0.2,
                        0.0, 1.0) * 1.2
        scale = (s * conf).astype(jnp.float32)
    else:
        scale = jnp.full((B, 1), s, jnp.float32)

    xn_bf = xn.astype(jnp.bfloat16)
    label2 = label.reshape(B, 1)

    # --- pad to sublane/lane friendly tiles (lane-dense output stores) ---
    tile_b = _round_up(min(tile_b, _round_up(B, 8)), 8)
    tile_n = _round_up(min(tile_n, _round_up(out_features, 128)), 128)
    Bp = _round_up(B, tile_b)
    Np = _round_up(out_features, tile_n)

    xn_bf = jnp.pad(xn_bf, ((0, Bp - B), (0, 0)))
    label2 = jnp.pad(label2, ((0, Bp - B), (0, 0)), constant_values=-1)
    phi = jnp.pad(phi, ((0, Bp - B), (0, 0)))
    scale = jnp.pad(scale, ((0, Bp - B), (0, 0)))
    wt_bf = jnp.pad(wt_bf, ((0, 0), (0, Np - out_features)))

    # Grid: class tiles OUTER ("parallel": megacore shards the class axis, each
    # TC gets a disjoint slice of the weight stream), batch tiles INNER
    # ("arbitrary": weight block index is constant across inner steps, so the
    # weight tile stays resident and is DMA'd exactly once per class tile).
    grid = (Np // tile_n, Bp // tile_b)

    kernel = functools.partial(gaussianface_kernel, tile_n=tile_n)

    # VMEM budget: double-buffered inputs/output + f32 temporaries; cap at
    # 64 MiB so the same config is safe on v7x (64 MiB physical per TC).
    est_vmem = (2 * (tile_b * in_features * 2 + in_features * tile_n * 2
                     + tile_b * tile_n * 4)
                + 2 * tile_b * tile_n * 4 + (1 << 20))
    vmem_limit = min(max(2 * est_vmem, 32 * 1024 * 1024), 64 * 1024 * 1024)

    cost = pl.CostEstimate(
        flops=2 * Bp * in_features * Np,
        transcendentals=0,
        bytes_accessed=(wt_bf.size * 2                        # weight: single pass
                        + xn_bf.size * 2 * grid[0]            # x re-read per class tile
                        + (label2.size + phi.size + scale.size) * 4 * grid[0]
                        + Bp * Np * 4))                       # f32 output writeback

    out = pl.pallas_call(
        kernel,
        out_shape=jax.ShapeDtypeStruct((Bp, Np), jnp.float32),
        grid_spec=pltpu.PrefetchScalarGridSpec(
            num_scalar_prefetch=0,
            grid=grid,
            in_specs=[
                pl.BlockSpec((tile_b, in_features), lambda j, i: (i, 0)),  # xn
                pl.BlockSpec((in_features, tile_n), lambda j, i: (0, j)),  # w^T (norm folded)
                pl.BlockSpec((tile_b, 1), lambda j, i: (i, 0)),            # label
                pl.BlockSpec((tile_b, 1), lambda j, i: (i, 0)),            # phi (fp32)
                pl.BlockSpec((tile_b, 1), lambda j, i: (i, 0)),            # scale
            ],
            out_specs=pl.BlockSpec((tile_b, tile_n), lambda j, i: (i, j)),
        ),
        compiler_params=pltpu.CompilerParams(
            dimension_semantics=("parallel", "arbitrary"),
            vmem_limit_bytes=vmem_limit),
        cost_estimate=cost,
    )(xn_bf, wt_bf, label2, phi, scale)

    return out[:B, :out_features]


def gaussian_face_ref(confidence, x, weight, label, *, s=64.0, m=0.5, gaussian=True):
    """Pure-JAX fp32 reference mirroring the PyTorch module forward."""
    xn = x / jnp.maximum(jnp.linalg.norm(x, axis=1, keepdims=True), 1e-12)
    wn = weight / jnp.maximum(jnp.linalg.norm(weight, axis=1, keepdims=True), 1e-12)
    cosine = xn @ wn.T
    sine = jnp.sqrt(jnp.maximum(1.0 - cosine ** 2, 0.0))
    phi = cosine * math.cos(m) - sine * math.sin(m)
    phi = phi.astype(jnp.float16).astype(jnp.float32)
    th = math.cos(math.pi - m)
    mm = math.sin(math.pi - m) * m
    phi = jnp.where(cosine > th, phi, cosine - mm)
    one_hot = jax.nn.one_hot(label, weight.shape[0], dtype=jnp.float32)
    out = jnp.where(one_hot == 0, cosine, phi)
    if gaussian:
        conf = jnp.clip(jnp.reshape(confidence, (-1, 1)) - 0.2, 0.0, 1.0) * 1.2
        out = out * s * conf
    else:
        out = out * s
    return out


if __name__ == "__main__":
    B = 16               # 2 batch tiles at tile_b=8
    in_features = 32
    out_features = 200   # not a multiple of 128 -> padding + 2 class tiles

    key = jax.random.PRNGKey(0)
    k_x, k_w, k_l, k_c = jax.random.split(key, 4)

    # kaiming_uniform_(a=sqrt(5)) on (out, in): bound = 1/sqrt(fan_in)
    bound = 1.0 / math.sqrt(in_features)
    weight = jax.random.uniform(k_w, (out_features, in_features),
                                jnp.float32, -bound, bound)
    x = jax.random.normal(k_x, (B, in_features), jnp.float32)
    label = jax.random.randint(k_l, (B,), 0, out_features, jnp.int32)
    confidence = jax.random.uniform(k_c, (B, 1), jnp.float32, 0.0, 1.0)

    # Small tiles so the (class-outer, batch-inner) grid is exercised: grid=(2,2).
    out = gaussian_face(confidence, x, weight, label, s=64.0, m=0.5, gaussian=True,
                        tile_b=8, tile_n=128)
    jax.block_until_ready(out)

    ref = gaussian_face_ref(confidence, x, weight, label, s=64.0, m=0.5, gaussian=True)

    assert out.shape == (B, out_features)
    assert out.dtype == jnp.float32
    assert bool(jnp.all(jnp.isfinite(out)))

    # Non-label columns come from the bf16 MXU -> loose tolerance overall...
    if not bool(jnp.allclose(out, ref, atol=1.0, rtol=0.02)):
        raise AssertionError(
            f"mismatch vs reference, max abs err = {float(jnp.max(jnp.abs(out - ref)))}")
    # ...but the label column (margin path) is now computed in fp32 -> tight check.
    rows = jnp.arange(B)
    if not bool(jnp.allclose(out[rows, label], ref[rows, label], atol=0.1)):
        raise AssertionError("label-column (phi) mismatch vs fp32 reference")

    # gaussian=False path.
    out_ng = gaussian_face(confidence, x, weight, label, s=64.0, m=0.5,
                           gaussian=False, tile_b=8, tile_n=128)
    ref_ng = gaussian_face_ref(confidence, x, weight, label, s=64.0, m=0.5,
                               gaussian=False)
    if not bool(jnp.allclose(out_ng, ref_ng, atol=1.0, rtol=0.02)):
        raise AssertionError("gaussian=False path mismatch vs reference")

    print("KERNEL_OK")
</pallas_src>

<mosaic_0001>
module attributes {stable_mosaic.version = 11 : i64} {
  func.func @gaussianface_kernel(%arg0: i32, %arg1: i32, %arg2: memref<8x32xbf16, #tpu.memory_space<vmem>>, %arg3: memref<32x128xbf16, #tpu.memory_space<vmem>>, %arg4: memref<8x1xi32, #tpu.memory_space<vmem>>, %arg5: memref<8x1xf32, #tpu.memory_space<vmem>>, %arg6: memref<8x1xf32, #tpu.memory_space<vmem>>, %arg7: memref<8x128xf32, #tpu.memory_space<vmem>>) attributes {dimension_semantics = [#tpu.dimension_semantics<parallel>, #tpu.dimension_semantics<arbitrary>], iteration_bounds = array<i64: 2, 2>, scalar_prefetch = 0 : i64, scratch_operands = 0 : i64, tpu.core_type = #tpu.core_type<tc>, window_params = [{transform_indices = @transform_0, window_bounds = array<i64: 8, 32>}, {transform_indices = @transform_1, window_bounds = array<i64: 32, 128>}, {transform_indices = @transform_2, window_bounds = array<i64: 8, 1>}, {transform_indices = @transform_3, window_bounds = array<i64: 8, 1>}, {transform_indices = @transform_4, window_bounds = array<i64: 8, 1>}, {transform_indices = @transform_5, window_bounds = array<i64: 8, 128>}]} {
    %c0 = arith.constant 0 : index
    %c0_0 = arith.constant 0 : index
    %0 = vector.load %arg2[%c0, %c0_0] : memref<8x32xbf16, #tpu.memory_space<vmem>>, vector<8x32xbf16>
    %c0_1 = arith.constant 0 : index
    %c0_2 = arith.constant 0 : index
    %1 = vector.load %arg3[%c0_1, %c0_2] : memref<32x128xbf16, #tpu.memory_space<vmem>>, vector<32x128xbf16>
    %cst = arith.constant dense<0.000000e+00> : vector<8x128xf32>
    %2 = tpu.matmul %0, %1, %cst {dimension_numbers = #tpu.dot_dimension_numbers<[1], [0], [0], [1], [0, 0, 1, 1], [], []>} : vector<8x32xbf16>, vector<32x128xbf16>, vector<8x128xf32> -> vector<8x128xf32>
    %c128_i32 = arith.constant 128 : i32
    %3 = arith.muli %arg0, %c128_i32 : i32
    %4 = tpu.iota {dimensions = array<i32: 1>} : vector<1x128xi32>
    %5 = vector.broadcast %3 : i32 to vector<1x128xi32>
    %6 = arith.addi %5, %4 : vector<1x128xi32>
    %c0_3 = arith.constant 0 : index
    %c0_4 = arith.constant 0 : index
    %7 = vector.load %arg4[%c0_3, %c0_4] : memref<8x1xi32, #tpu.memory_space<vmem>>, vector<8x1xi32>
    %8 = vector.broadcast %6 : vector<1x128xi32> to vector<8x128xi32>
    %9 = vector.broadcast %7 : vector<8x1xi32> to vector<8x128xi32>
    %10 = arith.cmpi eq, %8, %9 : vector<8x128xi32>
    %c0_5 = arith.constant 0 : index
    %c0_6 = arith.constant 0 : index
    %11 = vector.load %arg5[%c0_5, %c0_6] : memref<8x1xf32, #tpu.memory_space<vmem>>, vector<8x1xf32>
    %12 = vector.shape_cast %11 : vector<8x1xf32> to vector<8x1xf32>
    %13 = vector.broadcast %12 : vector<8x1xf32> to vector<8x128xf32>
    %14 = arith.select %10, %13, %2 : vector<8x128xi1>, vector<8x128xf32>
    %c0_7 = arith.constant 0 : index
    %c0_8 = arith.constant 0 : index
    %15 = vector.load %arg6[%c0_7, %c0_8] : memref<8x1xf32, #tpu.memory_space<vmem>>, vector<8x1xf32>
    %16 = vector.broadcast %15 : vector<8x1xf32> to vector<8x128xf32>
    %17 = arith.mulf %14, %16 : vector<8x128xf32>
    %c0_9 = arith.constant 0 : index
    %c0_10 = arith.constant 0 : index
    %18 = vector.load %arg7[%c0_9, %c0_10] : memref<8x128xf32, #tpu.memory_space<vmem>>, vector<8x128xf32>
    tpu.vector_store %arg7[%c0_9, %c0_10], %17 {strides = array<i32>} : memref<8x128xf32, #tpu.memory_space<vmem>>, vector<8x128xf32>,
    return
  }
  func.func @transform_0(%arg0: i32, %arg1: i32) -> (i32, i32) {
    %c0_i32 = arith.constant 0 : i32
    %c0_i32_0 = arith.constant 0 : i32
    return %arg1, %c0_i32 : i32, i32
  }
  func.func @transform_1(%arg0: i32, %arg1: i32) -> (i32, i32) {
    %c0_i32 = arith.constant 0 : i32
    %c0_i32_0 = arith.constant 0 : i32
    return %c0_i32, %arg0 : i32, i32
  }
  func.func @transform_2(%arg0: i32, %arg1: i32) -> (i32, i32) {
    %c0_i32 = arith.constant 0 : i32
    %c0_i32_0 = arith.constant 0 : i32
    return %arg1, %c0_i32 : i32, i32
  }
  func.func @transform_3(%arg0: i32, %arg1: i32) -> (i32, i32) {
    %c0_i32 = arith.constant 0 : i32
    %c0_i32_0 = arith.constant 0 : i32
    return %arg1, %c0_i32 : i32, i32
  }
  func.func @transform_4(%arg0: i32, %arg1: i32) -> (i32, i32) {
    %c0_i32 = arith.constant 0 : i32
    %c0_i32_0 = arith.constant 0 : i32
    return %arg1, %c0_i32 : i32, i32
  }
  func.func @transform_5(%arg0: i32, %arg1: i32) -> (i32, i32) {
    %c0_i32 = arith.constant 0 : i32
    return %arg1, %arg0 : i32, i32
  }
}

</mosaic_0001>

<bundles_post_ra>
// kernel: tpu_custom_call.1
= control target key start
LH: loop header
LB: loop body
LE: loop exit
PB: predicated region body
PF: predicated region fallthrough
CT: control target
= control target key end

     0   :  { %s1041_s0 = inlined_call_operand.vmem [shape: bf16[16,32], index: 0, kind: input, shape index: {}]   ;;  %s1042_s1 = inlined_call_operand.vmem [shape: bf16[32,256], index: 1, kind: input, shape index: {}]   ;;  %s1043_s2 = inlined_call_operand.vmem [shape: s32[16,1], index: 2, kind: input, shape index: {}]   ;;  %s1044_s3 = inlined_call_operand.vmem [shape: f32[16,1], index: 3, kind: input, shape index: {}]   ;;  %s1045_s4 = inlined_call_operand.vmem [shape: f32[16,1], index: 4, kind: input, shape index: {}]   ;;  %s1046_s5 = inlined_call_operand.hbm [shape: f32[16,256], index: 5, kind: output, shape index: {}]  }
   0x1   :  { %1050 = sst [smem:[#allocation9_spill]] %s1042_s1 }
   0x2   :  { %10 = vsyncpa [#allocation4], 0 }
   0x3   :  { %12 = vsyncpa [#allocation4 + $0x1], 0  ;;  %s860_s18 = smov 0   ;;  %s862_s19 = smov 0  }
   0x4   :  { %s864_s20 = smov 0   ;;  %s866_s21 = smov 0  }
   0x5   :  { %s868_s22 = smov 0   ;;  %s870_s23 = smov 0  }
   0x6   :  { %s872_s24 = smov 0   ;;  %s874_s25 = smov 0  }
   0x7   :  { %s876_s26 = smov 0   ;;  %s878_s27 = smov 0  }
   0x8 LB: > { %1051 = sst [smem:[#allocation6_spill]] %s820_s26  ;;  %s587_s28 = sadd.s32 4294967295, %s824_s27   ;;  %s824_s27 = sphi %s878_s27, %s18_s27   ;;  %s820_s26 = sphi %s876_s26, %s1060_s26   ;;  %s816_s25 = sphi %s874_s25, %s1067_s25   ;;  %s812_s24 = sphi %s872_s24, %s1058_s24   ;;  %s808_s23 = sphi %s870_s23, %s1066_s23   ;;  %s804_s22 = sphi %s868_s22, %s1065_s22   ;;  %s800_s21 = sphi %s866_s21, %s1064_s21   ;;  %s796_s20 = sphi %s864_s20, %s1063_s20   ;;  %s792_s19 = sphi %s862_s19, %s1062_s19   ;;  %s788_s18 = sphi %s860_s18, %s1061_s18  }
   0x9   : > { %s588_s29 = sadd.s32 4294967294, %s824_s27   ;;  %s27_s30 = sadd.s32 1, %s816_s25 }
   0xa   : > { %s30_s6 = sadd.s32 1, %s820_s26  ;;  %p28_p0 = scmp.ge.s32.totalorder %s27_s30, 2 }
   0xb   : > { %s63_s7 = sadd.s32 1, %s804_s22  ;;  %p70_p1 = scmp.ne.s32.totalorder %s804_s22, %s800_s21 }
   0xc   : > { %p71_p2 = scmp.eq.s32.totalorder %s824_s27, 0  ;;  %s1069_s30 = smov (%p28_p0, %s27_s30), 0 }
   0xd   : > { %1052 = sst [smem:[#allocation7_spill]] %s1069_s30  ;;  %s1071_s6 = smov (!%p28_p0, %s30_s6), %s820_s26 }
   0xe   : > { %p921_p3 = por %p71_p2, %p70_p1  ;;  %s164_s9 = ssub.s32 %s816_s25, %s1069_s30 }
   0xf   : > { %p32_p4 = scmp.ge.s32.totalorder %s1071_s6, 2  ;;  %s169_s10 = sadd.s32 1, %s796_s20 }
  0x10   : > { %p179_p5 = scmp.ne.s32.totalorder %s796_s20, %s792_s19  ;;  %p180_p6 = scmp.eq.s32.totalorder %s587_s28, 3 }
  0x11   : > { %s1073_s6 = smov (%p32_p4, %s1071_s6), 0  ;;  %p185_p8 = scmp.ne.s32.totalorder %s792_s19, %s788_s18 }
  0x12   : > { %1054 = sst [smem:[#allocation8_spill]] %s1073_s6  ;;  %p932_p7 = por %p180_p6, %p179_p5 }
  0x13   : > { %s60_s12 = ssub.s32 %s820_s26, %s1073_s6  ;;  %p186_p9 = scmp.eq.s32.totalorder %s588_s29, 3 }
  0x14   : > { %p61_p10 = scmp.eq.s32.totalorder %s60_s12, 0  ;;  %s166_s13 = sor.u32 %s164_s9, %s60_s12 }
  0x15   : > { %p167_p11 = scmp.eq.s32.totalorder %s166_s13, 0  ;;  %p940_p12 = por %p186_p9, %p185_p8 }
  0x16   : > { %s945_s15 = scalar_select %p61_p10, %s804_s22, %s63_s7  }
  0x17   : > { %s948_s16 = scalar_select %p167_p11, %s796_s20, %s169_s10  }
  0x18   : > { %p590_p13 = scmp.ge.s32.totalorder %s824_s27, 4 }
  0x1a   : > { %202 = sbr.rel (%p590_p13) target bundleno = 45 (0x2d), region = 16 }
  0x21   : > { %212 = sbr.rel (!%p921_p3) target bundleno = 45 (0x2d), region = 24  ;;  %s214_s17 = sand.u32 (%p921_p3), 1, %s804_s22  }
  0x22   : > { %s592_s28 = sshll.u32 (%p921_p3), %s820_s26, 2  ;;  %s591_s29 = sshll.u32 (%p921_p3), %s214_s17, 4 }
  0x23   : > { %s1057_s1 = sld [smem:[#allocation9_spill]] (%p921_p3)  ;;  %s216_s7 = scalar_lea.vmem (%p921_p3), [#allocation2], %s591_s29 }
  0x29   : > { %s218_s13 = scalar_lea.vmem %s1057_s1, %s592_s28 }
  0x2a   : > { %v234_v0 = vld [vmem:[%s218_s13] sm:$0xf]  ;;  %v236_v1 = vld [vmem:[%s218_s13 + $0x8] sm:$0xf]  ;;  %v238_v2 = vld [vmem:[%s218_s13 + $0x10] sm:$0xf] }
  0x2b   : > { %235 = vst [vmem:[%s216_s7] sm:$0xf] %v234_v0  ;;  %237 = vst [vmem:[%s216_s7 + $0x4] sm:$0xf] %v236_v1  ;;  %v240_v3 = vld [vmem:[%s218_s13 + $0x18] sm:$0xf] }
  0x2c   : > { %239 = vst [vmem:[%s216_s7 + $0x8] sm:$0xf] %v238_v2  ;;  %241 = vst [vmem:[%s216_s7 + $0xc] sm:$0xf] %v240_v3 }
  0x2d PF: > { %p593_p0 = scmp.ge.s32.totalorder %s824_s27, 1  ;;  %p292_p1 = scmp.lt.s32.totalorder %s824_s27, 5 }
  0x2f   : > { %p293_p2 = pnand %p593_p0, %p292_p1 }
  0x30   : > { %s299_s8 = sand.u32 (!%p293_p2), 1, %s800_s21   ;;  %p342_p3 = scmp.lt.s32.totalorder (!%p293_p2), %s808_s23, 1  ;;  %v826_v4 = vmov (!%p293_p2), 0.0   ;;  %vm827_vm0 = vmmov (!%p293_p2), 0   ;;  %v828_v5 = vmov (!%p293_p2), 0   ;;  %vm376_vm1 = vcmask (!%p293_p2), 261120  }
  0x31   : > { %296 = sbr.rel (%p293_p2) target bundleno = 292 (0x124), region = 77  ;;  %612 = vmatprep.subr.bf16.mxu0 (!%p293_p2), %v826_v4  ;;  %s594_s10 = sshll.u32 (!%p293_p2), %s299_s8, 4  ;;  %616 = vmatprep.mubr.msk.bf16.mxu0 (!%p293_p2), %vm827_vm0, %v826_v4  ;;  %v421_v12 = vlaneseq (!%p293_p2) }
  0x32   : > { %710 = vset.pattern.permute.xlu0 (!%p293_p2), %v828_v5  ;;  %711 = vset.pattern.permute.xlu1 (!%p293_p2), %v828_v5  ;;  %s301_s17 = scalar_lea.vmem (!%p293_p2), [#allocation2], %s594_s10  ;;  %s605_s12 = sshll.u32 (!%p293_p2), %s808_s23, 1 }
  0x33   : > { %v712_v6 = vld [vmem:[%s301_s17] sm:$0xff] (!%p293_p2)   ;;  %v713_v7 = vld [vmem:[%s301_s17 + $0x8] sm:$0xff] (!%p293_p2)   ;;  %v422_v13 = vand.u32 (!%p293_p2), 127, %v421_v12  ;;  %s457_s26 = sadd.s32 (!%p293_p2), %s812_s24, %s605_s12  ;;  %s829_s10 = smov (!%p293_p2), [#allocation3]  }
  0x34   : > { %613 = vmatpush3.bf16.msra.mxu0 (!%p293_p2), %v712_v6  ;;  %s718_s17 = sshll.u32 (!%p293_p2), %s829_s10, 4  ;;  %s719_s17 = int_to_ptr.vmem [resolvable:$false] %s718_s17 }
  0x35   : > { %614 = vmatprep.subr.bf16.mxu0 (!%p293_p2), %v826_v4 }
  0x38   : > { %s343_s28 = scalar_select %p342_p3, %s808_s23, 1  ;;  %615 = vmatpush3.bf16.msra.mxu0 %v713_v7 }
  0x3a   : > { %s596_s29 = sshll.u32 %s343_s28, 2  ;;  %s597_s9 = sshll.u32 %s343_s28, 3 }
  0x3b   : > { %s345_s21 = scalar_lea.vmem %s1041_s0, %s596_s29  ;;  %s349_s1 = scalar_lea.vmem %s1043_s2, %s597_s9 }
  0x3c   : > { %v425_v8 = vld [vmem:[%s349_s1] sm:$0xff]  ;;  %s353_s30 = scalar_lea.vmem %s1044_s3, %s597_s9  ;;  %s357_s28 = scalar_lea.vmem %s1045_s4, %s597_s9 }
  0x3d   : > { %427 = vperm.xlu0 %710, %v425_v8   ;;  %v437_v9 = vld [vmem:[%s357_s28] sm:$0xff]  ;;  %s603_s1 = sshll.u32 %s812_s24, 7  ;;  %s339_s29 = sand.u32 1, %s792_s19  }
  0x3e   : > { %v359_v10 = vld [vmem:[%s345_s21] sm:$0xf]  ;;  %440 = vperm.xlu1 %711, %v437_v9   ;;  %v423_v14 = vstv %s603_s1  ;;  %s595_s6 = sshll.u32 %s339_s29, 3  ;;  %s606_s9 = sshll.u32 %s457_s26, 7 }
  0x3f   : > { %v430_v11 = vld [vmem:[%s353_s30] sm:$0xff]  ;;  %617 = vmatmul.mubr.msk.bf16.vlgmr.msra.gmra.mrb[0].mxu0 %vm376_vm1, %v359_v10  ;;  %v424_v16 = vadd.s32 %v423_v14, %v422_v13  ;;  %s341_s13 = scalar_lea.vmem [#allocation3], %s595_s6  ;;  %s982_s8 = scalar_lea.hbm %s1046_s5, %s606_s9 }
  0x40   : > { %s461_s21 = sshll.u32 %s341_s13, 4  ;;  %s446_s23 = scalar_lea.sflag [#allocation4], %s339_s29  ;;  %s984_s21 = int_to_ptr.vmem [resolvable:$true] %s461_s21 }
  0x41   : > { %433 = vperm.xlu0 %710, %v430_v11   ;;  %s714_s24 = scalar_lea.vmem %s984_s21, 128  ;;  %s720_s28 = scalar_lea.vmem %s719_s17, 256 }
  0x42   : > { %p715_p4 = scmp.ne.s32.totalorder %s984_s21, %s714_s24  ;;  %p721_p8 = scmp.lt.s32.totalorder %s984_s21, %s719_s17 }
  0x43   : > { %p722_p9 = scmp.lt.s32.totalorder %s720_s28, %s714_s24 }
  0x44   : > { %p716_p5 = pnand %p715_p4, %p932_p7 }
  0x45   : > { %p723_p10 = por %p722_p9, %p721_p8 }
  0x46   : > { %p717_p6 = pneg %p716_p5 }
  0x48   : > { %p724_p11 = pnand %p723_p10, %p717_p6 }
  0xbc   : > { %v428_v15 = vpop.permute.xlu0 %427 }
  0xbd   : > { %v441_v17 = vpop.permute.xlu1 %440  ;;  %vm429_vm2 = vcmp.eq.s32.totalorder %v424_v16, %v428_v15 }
  0xc0   : > { %v434_v18 = vpop.permute.xlu0 %433 }
 0x112   : > { %v414_v19 = vpop.f32.mrb[0].mxu0 }
 0x113   : > { %v436_v20 = vsel %vm429_vm2, %v434_v18, %v414_v19  ;;  %v618_v21 = vpop.f32.mrb[1].mxu0 }
 0x114   : > { %v443_v22 = vmul.f32 %v441_v17, %v436_v20  ;;  %v417_v23 = vpop.f32.mrb[2].mxu0 }
 0x115   : > { %v619_v24 = vpop.f32.mrb[3].mxu0 }
 0x116   : > { %444 = vst [vmem:[%s341_s13] sm:$0xff] %v443_v22 }
 0x117   : > { %727 = shalt.err (!%p724_p11)
}
 0x118   : > { %s728_s1 = scalar_lea.hbm %s982_s8, 128  ;;  %s732_s12 = scalar_lea.hbm %s1046_s5, 512 }
 0x119   : > { %p729_p13 = scmp.ne.s32.totalorder %s982_s8, %s728_s1  ;;  %p733_p2 = scmp.lt.u32.totalorder %s982_s8, %s1046_s5 }
 0x11a   : > { %p734_p3 = scmp.lt.u32.totalorder %s732_s12, %s728_s1  ;;  %p736_p5 = scmp.lt.u32.totalorder %s728_s1, %s982_s8 }
 0x11b   : > { %p730_p0 = pnand %p729_p13, %p932_p7 }
 0x11c   : > { %p735_p4 = por %p734_p3, %p733_p2 }
 0x11d   : > { %p731_p1 = pneg %p730_p0 }
 0x11e   : > { %p737_p6 = por %p736_p5, %p735_p4 }
 0x120   : > { %p738_p8 = pnand %p737_p6, %p731_p1 }
 0x122   : > { %741 = shalt.err (!%p738_p8)
}
 0x123   : > { %620 = dma.vmem_to_hbm [thread:$0]  (%p932_p7), %s984_s21, 128, %s982_s8, %s446_s23  }
 0x124 PF: > { %p626_p9 = scmp.ge.s32.totalorder %s824_s27, 2  ;;  %s473_s13 = sand.u32 1, %s788_s18  }
 0x125   : > { %s474_s30 = scalar_lea.sflag [#allocation4], %s473_s13 }
 0x126   : > { %p623_p10 = pnand %p626_p9, %p940_p12 }
 0x128   : > { %783 = dma.done.wait (!%p623_p10), %s474_s30, 128  }
 0x129   : > { %785 = vsyncadd (!%p623_p10), %s474_s30, 4294967168  ;;  %s18_s27 = sadd.s32 1, %s824_s27   ;;  %s1058_s24 = sld [smem:[#allocation6_spill]] }
 0x12a   : > { %p15_p11 = scmp.ge.s32.totalorder %s18_s27, 6   ;;  %s1059_s11 = sld [smem:[#allocation7_spill]] }
 0x12b   : > { %s1060_s26 = sld [smem:[#allocation8_spill]]  ;;  %s1061_s18 = smov %s792_s19 }
 0x12c   : > { %s1062_s19 = smov %s796_s20  ;;  %s1063_s20 = smov %s948_s16 }
 0x12d   : > { %s1064_s21 = smov %s804_s22  ;;  %s1065_s22 = smov %s945_s15 }
 0x12e   : > { %s1066_s23 = smov %s816_s25  ;;  %17 = sbr.rel (!%p15_p11) target bundleno = 8 (0x8), region = 133 }
 0x130   : > { %s1067_s25 = smov %s1059_s11 }
 0x135   :  { %479 = vsyncpa [#allocation4], 1 }
 0x136   :  { %481 = vsyncpa [#allocation4 + $0x1], 1 }

</bundles_post_ra>
